<compile_context>
chip_gen: v7x
topology: tpu7x:2x2x1
jax: 0.10.0
libtpu: 0.0.40
codegen_flags: <defaults>
</compile_context>

<pallas_src>
import jax
import jax.numpy as jnp
from jax.experimental import pallas as pl
from jax.experimental.pallas import tpu as pltpu


def upsample_pallas(x_nchw, weight, bias, *, compute_dtype=None):
    """ReplicationPad2d(1) + ConvTranspose2d(C, C, 4, stride=2, padding=3).

    x_nchw: (N, C, H, W); weight: (Cin, Cout, 4, 4) (torch ConvTranspose2d layout);
    bias: (Cout,).  Returns (N, C, 2H, 2W).
    """
    N, C, H, W = x_nchw.shape
    Cin, Cout, KH, KW = weight.shape
    assert Cin == C and Cout == C and KH == 4 and KW == 4
    out_dtype = x_nchw.dtype
    cdt = compute_dtype or out_dtype   # streaming dtype of patches/weight (accum is f32)

    Hp, Wp = H + 2, W + 2
    M = H * Wp                 # matmul columns per image: m' = a*Wp + b, b in [0, Wp)
    K = 9 * Cin                # contraction: 3x3 taps x Cin
    TAIL = 2 * Wp + 2          # halo so the largest tap shift stays in bounds

    # ---- wrapper layout glue (O(input) bytes, fused by XLA) --------------------------
    # ReplicationPad2d(1) == edge padding.
    x_pad = jnp.pad(x_nchw, ((0, 0), (0, 0), (1, 1), (1, 1)), mode="edge")  # (N,C,Hp,Wp)
    x_flat = x_pad.reshape(N, C, Hp * Wp).astype(cdt)        # free reshape (+ opt. cast)
    x_flat = jnp.pad(x_flat, ((0, 0), (0, 0), (0, TAIL)))    # (N, C, Lin)
    Lin = Hp * Wp + TAIL

    # ---- fold the transposed conv into one (4*Cout, 9*Cin) matrix --------------------
    # Sub-pixel form of ConvTranspose2d(k=4, s=2, p=3) applied to the padded input:
    #   y[n, co, 2a+ry, 2b+rx] = bias[co]
    #     + sum_{ci, ty in {ry,ry+1}, tx in {rx,rx+1}}
    #         x_pad[n, ci, a+ty, b+tx] * weight[ci, co, 3+ry-2*ty, 3+rx-2*tx]
    # Rows ordered (cout, ry, rx); columns ordered (ty, tx, cin) to match the patch rows.
    w_big = jnp.zeros((Cout, 2, 2, 3, 3, Cin), dtype=jnp.float32)
    for ry in (0, 1):
        for rx in (0, 1):
            for ty in (ry, ry + 1):
                for tx in (rx, rx + 1):
                    ki = 3 + ry - 2 * ty
                    kj = 3 + rx - 2 * tx
                    w_big = w_big.at[:, ry, rx, ty, tx, :].set(
                        weight[:, :, ki, kj].astype(jnp.float32).T)
    wt = w_big.reshape(4 * Cout, K).astype(cdt)                       # (4*Cout, K)
    bias_col = jnp.repeat(bias.astype(jnp.float32), 4).reshape(4 * Cout, 1)

    # ---- kernel -----------------------------------------------------------------------
    def kernel(x_ref, w_ref, b_ref, o_ref, p_ref):
        # x_ref: (1, Cin, Lin)    flat edge-padded input (padded row stride Wp)
        # w_ref: (4*Cout, K)      resident folded weight
        # b_ref: (4*Cout, 1)      bias column
        # o_ref: (1, 4*Cout, M)   output phases, lane-dense over m' = a*Wp + b
        # p_ref: (K, M)           VMEM patch scratch
        for t in range(9):                      # 9 static lane-shifted slices -> scratch
            ty, tx = divmod(t, 3)
            shift = ty * Wp + tx
            p_ref[t * Cin:(t + 1) * Cin, :] = x_ref[0, :, pl.ds(shift, M)]
        acc = jnp.dot(w_ref[...], p_ref[...], preferred_element_type=jnp.float32)
        o_ref[0] = (acc + b_ref[...]).astype(o_ref.dtype)

    out = pl.pallas_call(
        kernel,
        out_shape=jax.ShapeDtypeStruct((N, 4 * Cout, M), out_dtype),
        grid_spec=pltpu.PrefetchScalarGridSpec(
            num_scalar_prefetch=0,
            grid=(N,),
            in_specs=[
                pl.BlockSpec((1, C, Lin), lambda n: (n, 0, 0)),       # streams
                pl.BlockSpec((4 * Cout, K), lambda n: (0, 0)),        # resident weight
                pl.BlockSpec((4 * Cout, 1), lambda n: (0, 0)),        # resident bias
            ],
            out_specs=pl.BlockSpec((1, 4 * Cout, M), lambda n: (n, 0, 0)),
            scratch_shapes=[pltpu.VMEM((K, M), cdt)],
        ),
        compiler_params=pltpu.CompilerParams(
            dimension_semantics=("parallel",),
        ),
    )(x_flat, wt, bias_col)

    # ---- remaining pixel-shuffle: local per-channel transpose, W innermost -----------
    out = out.reshape(N, Cout, 2, 2, H, Wp)[..., :W]   # (n, cout, ry, rx, a, b)
    out = jnp.transpose(out, (0, 1, 4, 2, 5, 3))       # (n, cout, a, ry, b, rx)
    return out.reshape(N, Cout, 2 * H, 2 * W)


def _reference_upsample(x_nchw, weight, bias):
    """Plain-JAX reference: ReplicationPad2d(1) + ConvTranspose2d(C, C, 4, stride=2, padding=3)."""
    x_pad = jnp.pad(x_nchw, ((0, 0), (0, 0), (1, 1), (1, 1)), mode="edge")
    # ConvTranspose2d == lhs-dilated conv with flipped, channel-swapped kernel;
    # effective padding per side = k - 1 - p = 0.
    w_flip = jnp.transpose(weight, (1, 0, 2, 3))[:, :, ::-1, ::-1]
    y = jax.lax.conv_general_dilated(
        x_pad, w_flip,
        window_strides=(1, 1),
        padding=((0, 0), (0, 0)),
        lhs_dilation=(2, 2),
        dimension_numbers=("NCHW", "OIHW", "NCHW"),
    )
    return y + bias.reshape(1, -1, 1, 1)


if __name__ == "__main__":
    key = jax.random.PRNGKey(0)
    k_x, k_w, k_b = jax.random.split(key, 3)

    N, C, H, W = 2, 4, 16, 16
    x = jax.random.normal(k_x, (N, C, H, W), dtype=jnp.float32)

    # Deterministic ConvTranspose2d-style params: weight (Cin, Cout, 4, 4), bias (Cout,).
    fan_in = C * 4 * 4
    bound = 1.0 / (fan_in ** 0.5)
    weight = jax.random.uniform(k_w, (C, C, 4, 4), minval=-bound, maxval=bound,
                                dtype=jnp.float32)
    bias = jax.random.uniform(k_b, (C,), minval=-bound, maxval=bound, dtype=jnp.float32)

    out = jax.block_until_ready(upsample_pallas(x, weight, bias))
    ref = jax.block_until_ready(_reference_upsample(x, weight, bias))

    assert out.shape == (N, C, 2 * H, 2 * W), out.shape
    assert jnp.allclose(out, ref, atol=1e-4, rtol=1e-4), float(jnp.max(jnp.abs(out - ref)))

    print("KERNEL_OK")
</pallas_src>

<mosaic_0001>
module attributes {stable_mosaic.version = 11 : i64} {
  func.func @kernel(%arg0: i32, %arg1: memref<1x4x362xf32, #tpu.memory_space<vmem>>, %arg2: memref<16x36xf32, #tpu.memory_space<vmem>>, %arg3: memref<16x1xf32, #tpu.memory_space<vmem>>, %arg4: memref<1x16x288xf32, #tpu.memory_space<vmem>>, %arg5: memref<36x288xf32, #tpu.memory_space<vmem>>) attributes {dimension_semantics = [#tpu.dimension_semantics<parallel>], iteration_bounds = array<i64: 2>, scalar_prefetch = 0 : i64, scratch_operands = 1 : i64, tpu.core_type = #tpu.core_type<tc>, window_params = [{transform_indices = @transform_0, window_bounds = array<i64: 1, 4, 362>}, {pipeline_mode = #tpu.pipeline_mode<synchronous>, transform_indices = @transform_1, window_bounds = array<i64: 16, 36>}, {pipeline_mode = #tpu.pipeline_mode<synchronous>, transform_indices = @transform_2, window_bounds = array<i64: 16, 1>}, {transform_indices = @transform_3, window_bounds = array<i64: 1, 16, 288>}]} {
    %c0 = arith.constant 0 : index
    %c0_0 = arith.constant 0 : index
    %c0_1 = arith.constant 0 : index
    %0 = vector.load %arg1[%c0, %c0_0, %c0_1] : memref<1x4x362xf32, #tpu.memory_space<vmem>>, vector<1x4x288xf32>
    %1 = vector.shape_cast %0 : vector<1x4x288xf32> to vector<4x288xf32>
    %c0_2 = arith.constant 0 : index
    %c0_3 = arith.constant 0 : index
    %2 = vector.load %arg5[%c0_2, %c0_3] : memref<36x288xf32, #tpu.memory_space<vmem>>, vector<4x288xf32>
    tpu.vector_store %arg5[%c0_2, %c0_3], %1 {strides = array<i32>} : memref<36x288xf32, #tpu.memory_space<vmem>>, vector<4x288xf32>,
    %c0_4 = arith.constant 0 : index
    %c0_5 = arith.constant 0 : index
    %c1 = arith.constant 1 : index
    %3 = vector.load %arg1[%c0_4, %c0_5, %c1] : memref<1x4x362xf32, #tpu.memory_space<vmem>>, vector<1x4x288xf32>
    %4 = vector.shape_cast %3 : vector<1x4x288xf32> to vector<4x288xf32>
    %c4 = arith.constant 4 : index
    %c0_6 = arith.constant 0 : index
    %5 = vector.load %arg5[%c4, %c0_6] : memref<36x288xf32, #tpu.memory_space<vmem>>, vector<4x288xf32>
    tpu.vector_store %arg5[%c4, %c0_6], %4 {strides = array<i32>} : memref<36x288xf32, #tpu.memory_space<vmem>>, vector<4x288xf32>,
    %c0_7 = arith.constant 0 : index
    %c0_8 = arith.constant 0 : index
    %c2 = arith.constant 2 : index
    %6 = vector.load %arg1[%c0_7, %c0_8, %c2] : memref<1x4x362xf32, #tpu.memory_space<vmem>>, vector<1x4x288xf32>
    %7 = vector.shape_cast %6 : vector<1x4x288xf32> to vector<4x288xf32>
    %c8 = arith.constant 8 : index
    %c0_9 = arith.constant 0 : index
    %8 = vector.load %arg5[%c8, %c0_9] : memref<36x288xf32, #tpu.memory_space<vmem>>, vector<4x288xf32>
    tpu.vector_store %arg5[%c8, %c0_9], %7 {strides = array<i32>} : memref<36x288xf32, #tpu.memory_space<vmem>>, vector<4x288xf32>,
    %c0_10 = arith.constant 0 : index
    %c0_11 = arith.constant 0 : index
    %c18 = arith.constant 18 : index
    %9 = vector.load %arg1[%c0_10, %c0_11, %c18] : memref<1x4x362xf32, #tpu.memory_space<vmem>>, vector<1x4x288xf32>
    %10 = vector.shape_cast %9 : vector<1x4x288xf32> to vector<4x288xf32>
    %c12 = arith.constant 12 : index
    %c0_12 = arith.constant 0 : index
    %11 = vector.load %arg5[%c12, %c0_12] : memref<36x288xf32, #tpu.memory_space<vmem>>, vector<4x288xf32>
    tpu.vector_store %arg5[%c12, %c0_12], %10 {strides = array<i32>} : memref<36x288xf32, #tpu.memory_space<vmem>>, vector<4x288xf32>,
    %c0_13 = arith.constant 0 : index
    %c0_14 = arith.constant 0 : index
    %c19 = arith.constant 19 : index
    %12 = vector.load %arg1[%c0_13, %c0_14, %c19] : memref<1x4x362xf32, #tpu.memory_space<vmem>>, vector<1x4x288xf32>
    %13 = vector.shape_cast %12 : vector<1x4x288xf32> to vector<4x288xf32>
    %c16 = arith.constant 16 : index
    %c0_15 = arith.constant 0 : index
    %14 = vector.load %arg5[%c16, %c0_15] : memref<36x288xf32, #tpu.memory_space<vmem>>, vector<4x288xf32>
    tpu.vector_store %arg5[%c16, %c0_15], %13 {strides = array<i32>} : memref<36x288xf32, #tpu.memory_space<vmem>>, vector<4x288xf32>,
    %c0_16 = arith.constant 0 : index
    %c0_17 = arith.constant 0 : index
    %c20 = arith.constant 20 : index
    %15 = vector.load %arg1[%c0_16, %c0_17, %c20] : memref<1x4x362xf32, #tpu.memory_space<vmem>>, vector<1x4x288xf32>
    %16 = vector.shape_cast %15 : vector<1x4x288xf32> to vector<4x288xf32>
    %c20_18 = arith.constant 20 : index
    %c0_19 = arith.constant 0 : index
    %17 = vector.load %arg5[%c20_18, %c0_19] : memref<36x288xf32, #tpu.memory_space<vmem>>, vector<4x288xf32>
    tpu.vector_store %arg5[%c20_18, %c0_19], %16 {strides = array<i32>} : memref<36x288xf32, #tpu.memory_space<vmem>>, vector<4x288xf32>,
    %c0_20 = arith.constant 0 : index
    %c0_21 = arith.constant 0 : index
    %c36 = arith.constant 36 : index
    %18 = vector.load %arg1[%c0_20, %c0_21, %c36] : memref<1x4x362xf32, #tpu.memory_space<vmem>>, vector<1x4x288xf32>
    %19 = vector.shape_cast %18 : vector<1x4x288xf32> to vector<4x288xf32>
    %c24 = arith.constant 24 : index
    %c0_22 = arith.constant 0 : index
    %20 = vector.load %arg5[%c24, %c0_22] : memref<36x288xf32, #tpu.memory_space<vmem>>, vector<4x288xf32>
    tpu.vector_store %arg5[%c24, %c0_22], %19 {strides = array<i32>} : memref<36x288xf32, #tpu.memory_space<vmem>>, vector<4x288xf32>,
    %c0_23 = arith.constant 0 : index
    %c0_24 = arith.constant 0 : index
    %c37 = arith.constant 37 : index
    %21 = vector.load %arg1[%c0_23, %c0_24, %c37] : memref<1x4x362xf32, #tpu.memory_space<vmem>>, vector<1x4x288xf32>
    %22 = vector.shape_cast %21 : vector<1x4x288xf32> to vector<4x288xf32>
    %c28 = arith.constant 28 : index
    %c0_25 = arith.constant 0 : index
    %23 = vector.load %arg5[%c28, %c0_25] : memref<36x288xf32, #tpu.memory_space<vmem>>, vector<4x288xf32>
    tpu.vector_store %arg5[%c28, %c0_25], %22 {strides = array<i32>} : memref<36x288xf32, #tpu.memory_space<vmem>>, vector<4x288xf32>,
    %c0_26 = arith.constant 0 : index
    %c0_27 = arith.constant 0 : index
    %c38 = arith.constant 38 : index
    %24 = vector.load %arg1[%c0_26, %c0_27, %c38] : memref<1x4x362xf32, #tpu.memory_space<vmem>>, vector<1x4x288xf32>
    %25 = vector.shape_cast %24 : vector<1x4x288xf32> to vector<4x288xf32>
    %c32 = arith.constant 32 : index
    %c0_28 = arith.constant 0 : index
    %26 = vector.load %arg5[%c32, %c0_28] : memref<36x288xf32, #tpu.memory_space<vmem>>, vector<4x288xf32>
    tpu.vector_store %arg5[%c32, %c0_28], %25 {strides = array<i32>} : memref<36x288xf32, #tpu.memory_space<vmem>>, vector<4x288xf32>,
    %c0_29 = arith.constant 0 : index
    %c0_30 = arith.constant 0 : index
    %27 = vector.load %arg2[%c0_29, %c0_30] : memref<16x36xf32, #tpu.memory_space<vmem>>, vector<16x36xf32>
    %c0_31 = arith.constant 0 : index
    %c0_32 = arith.constant 0 : index
    %28 = vector.load %arg5[%c0_31, %c0_32] : memref<36x288xf32, #tpu.memory_space<vmem>>, vector<36x288xf32>
    %cst = arith.constant dense<0.000000e+00> : vector<16x288xf32>
    %29 = tpu.matmul %27, %28, %cst {dimension_numbers = #tpu.dot_dimension_numbers<[1], [0], [0], [1], [0, 0, 1, 1], [], []>} : vector<16x36xf32>, vector<36x288xf32>, vector<16x288xf32> -> vector<16x288xf32>
    %c0_33 = arith.constant 0 : index
    %c0_34 = arith.constant 0 : index
    %30 = vector.load %arg3[%c0_33, %c0_34] : memref<16x1xf32, #tpu.memory_space<vmem>>, vector<16x1xf32>
    %31 = vector.broadcast %30 : vector<16x1xf32> to vector<16x288xf32>
    %32 = arith.addf %29, %31 : vector<16x288xf32>
    %c0_35 = arith.constant 0 : index
    %c0_36 = arith.constant 0 : index
    %c0_37 = arith.constant 0 : index
    %33 = vector.load %arg4[%c0_35, %c0_36, %c0_37] : memref<1x16x288xf32, #tpu.memory_space<vmem>>, vector<1x16x288xf32>
    %34 = vector.shape_cast %33 : vector<1x16x288xf32> to vector<16x288xf32>
    %35 = vector.shape_cast %32 : vector<16x288xf32> to vector<1x16x288xf32>
    tpu.vector_store %arg4[%c0_35, %c0_36, %c0_37], %35 {strides = array<i32>} : memref<1x16x288xf32, #tpu.memory_space<vmem>>, vector<1x16x288xf32>,
    return
  }
  func.func @transform_0(%arg0: i32) -> (i32, i32, i32) {
    %c0_i32 = arith.constant 0 : i32
    %c0_i32_0 = arith.constant 0 : i32
    %c0_i32_1 = arith.constant 0 : i32
    return %arg0, %c0_i32, %c0_i32_0 : i32, i32, i32
  }
  func.func @transform_1(%arg0: i32) -> (i32, i32) {
    %c0_i32 = arith.constant 0 : i32
    %c0_i32_0 = arith.constant 0 : i32
    %c0_i32_1 = arith.constant 0 : i32
    return %c0_i32, %c0_i32_0 : i32, i32
  }
  func.func @transform_2(%arg0: i32) -> (i32, i32) {
    %c0_i32 = arith.constant 0 : i32
    %c0_i32_0 = arith.constant 0 : i32
    %c0_i32_1 = arith.constant 0 : i32
    return %c0_i32, %c0_i32_0 : i32, i32
  }
  func.func @transform_3(%arg0: i32) -> (i32, i32, i32) {
    %c0_i32 = arith.constant 0 : i32
    %c0_i32_0 = arith.constant 0 : i32
    %c0_i32_1 = arith.constant 0 : i32
    return %arg0, %c0_i32, %c0_i32_0 : i32, i32, i32
  }
}

</mosaic_0001>

<bundles_post_ra>
// kernel: tpu_custom_call.1
= control target key start
LH: loop header
LB: loop body
LE: loop exit
PB: predicated region body
PF: predicated region fallthrough
CT: control target
= control target key end

     0   :  { %8 = vsyncpa [#allocation4], 0  ;;  %s1120_s0 = inlined_call_operand.hbm [shape: f32[2,4,362], index: 0, kind: input, shape index: {}]   ;;  %s1121_s1 = inlined_call_operand.vmem [shape: f32[16,36], index: 1, kind: input, shape index: {}]   ;;  %s1122_s2 = inlined_call_operand.vmem [shape: f32[16,1], index: 2, kind: input, shape index: {}]   ;;  %s1123_s3 = inlined_call_operand.hbm [shape: f32[2,16,288], index: 3, kind: output, shape index: {}]  }
   0x1   :  { %10 = vsyncpa [#allocation4 + $0x1], 0 }
   0x2   :  { %11 = vsyncpa [#allocation5], 0 }
   0x3   :  { %13 = vsyncpa [#allocation5 + $0x1], 0  ;;  %s907_s12 = smov 0   ;;  %s909_s13 = smov 0  }
   0x4   :  { %s911_s14 = smov 0   ;;  %s913_s15 = smov 0  }
   0x5 LB: > { %s928_s16 = sadd.s32 4294967295, %s871_s15   ;;  %s653_s17 = sadd.s32 4294967294, %s871_s15   ;;  %s871_s15 = sphi %s913_s15, %s1137_s15   ;;  %s867_s14 = sphi %s911_s14, %s1136_s14   ;;  %s863_s13 = sphi %s909_s13, %s1135_s13   ;;  %s859_s12 = sphi %s907_s12, %s1134_s12  }
   0x6   : > { %s932_s18 = sadd.s32 1, %s871_s15   ;;  %s26_s19 = sadd.s32 1, %s867_s14 }
   0x7   : > { %s23_s20 = ssub.s32 %s871_s15, %s932_s18  ;;  %p33_p0 = scmp.ne.s32.totalorder %s867_s14, %s863_s13 }
   0x8   : > { %p24_p1 = scmp.eq.s32.totalorder %s23_s20, 0  ;;  %p34_p2 = scmp.eq.s32.totalorder %s871_s15, 0 }
   0x9   : > { %p39_p3 = scmp.ne.s32.totalorder %s863_s13, %s859_s12  ;;  %p40_p4 = scmp.eq.s32.totalorder %s928_s16, 0 }
   0xa   : > { %s944_s21 = scalar_select %p24_p1, %s867_s14, %s26_s19  }
   0xb   : > { %p35_p5 = por %p34_p2, %p33_p0  ;;  %p946_p6 = por %p40_p4, %p39_p3 }
   0xc   : > { %p105_p7 = scmp.eq.s32.totalorder %s928_s16, 1  ;;  %p111_p8 = scmp.eq.s32.totalorder %s653_s17, 1 }
   0xd   : > { %p721_p10 = scmp.lt.s32.totalorder %s871_s15, 2  ;;  %s137_s25 = sand.u32 1, %s867_s14  }
   0xe   : > { %p953_p11 = por %p105_p7, %p33_p0  ;;  %p957_p12 = por %p111_p8, %p39_p3 }
   0xf   : > { %s705_s26 = smul.u32 192, %s871_s15  ;;  %p968_p13 = pnand %p721_p10, %p35_p5 }
  0x10   : > { %s1126_s23 = scalar_select %p953_p11, 1, 0 }
  0x11   : > { %s1127_s24 = scalar_select %p957_p12, 1, 0 }
  0x12   : > { %s704_s27 = smul.u32 12, %s137_s25  ;;  %s966_s30 = scalar_lea.hbm %s1120_s0, %s705_s26 }
  0x13   : > { %s138_s7 = scalar_lea.sflag [#allocation4], %s137_s25  ;;  %s775_s8 = scalar_lea.hbm %s966_s30, 192 }
  0x14   : > { %s141_s5 = scalar_lea.vmem [#allocation3], %s704_s27  ;;  %p776_p2 = scmp.ne.s32.totalorder %s966_s30, %s775_s8 }
  0x15   : > { %s149_s6 = sshll.u32 %s141_s5, 4  ;;  %p777_p3 = pneg %p968_p13  ;;  %s973_s6 = int_to_ptr.vmem [resolvable:$true] %s149_s6 }
  0x16   : > { %s780_s11 = scalar_lea.hbm %s1120_s0, 384  ;;  %p781_p7 = scmp.lt.u32.totalorder %s966_s30, %s1120_s0 }
  0x17   : > { %p778_p4 = pnand %p777_p3, %p776_p2  ;;  %p782_p8 = scmp.lt.u32.totalorder %s780_s11, %s775_s8 }
  0x18   : > { %p784_p9 = scmp.lt.u32.totalorder %s775_s8, %s966_s30 }
  0x19   : > { %p779_p5 = pneg %p778_p4  ;;  %p783_p10 = por %p782_p8, %p781_p7 }
  0x1b   : > { %p785_p0 = por %p784_p9, %p783_p10 }
  0x1d   : > { %p786_p1 = pnand %p785_p0, %p779_p5 }
  0x1f   : > { %789 = shalt.err (!%p786_p1)
}
  0x20   : > { %s790_s20 = scalar_lea.vmem %s973_s6, 192  ;;  %s873_s25 = smov [#allocation3]  }
  0x21   : > { %p791_p2 = scmp.ne.s32.totalorder %s973_s6, %s790_s20  ;;  %s795_s26 = sshll.u32 %s873_s25, 4  ;;  %s796_s26 = int_to_ptr.vmem [resolvable:$false] %s795_s26 }
  0x22   : > { %s797_s27 = scalar_lea.vmem %s796_s26, 384  ;;  %p798_p11 = scmp.lt.s32.totalorder %s973_s6, %s796_s26 }
  0x23   : > { %p793_p4 = pnand %p791_p2, %p777_p3  ;;  %p799_p7 = scmp.lt.s32.totalorder %s797_s27, %s790_s20 }
  0x25   : > { %p794_p12 = pneg %p793_p4  ;;  %p800_p8 = por %p799_p7, %p798_p11 }
  0x27   : > { %p801_p9 = pnand %p800_p8, %p794_p12 }
  0x29   : > { %804 = shalt.err (!%p801_p9)
}
  0x2a   : > { %716 = dma.hbm_to_vmem [thread:$0]  (!%p968_p13), %s966_s30, 192, %s973_s6, %s138_s7  }
  0x2b   : > { %p1129_p0 = scmp.lt.s32.totalorder %s871_s15, 3  ;;  %p1130_p1 = scmp.ge.s32.totalorder %s871_s15, 1 }
  0x2d   : > { %p155_p3 = pnand %p1130_p1, %p1129_p0 }
  0x2e   : > { %s1006_s28 = sand.u32 (!%p155_p3), 1, %s863_s13  }
  0x2f   : > { %158 = sbr.rel (%p155_p3) target bundleno = 461 (0x1cd), region = 32  ;;  %s161_s5 = scalar_lea.sflag (!%p155_p3), [#allocation4], %s1006_s28 }
  0x30   : > { %s706_s29 = smul.u32 (!%p155_p3), 12, %s1006_s28 }
  0x32   : > { %s1010_s8 = scalar_lea.vmem (!%p155_p3), [#allocation3], %s706_s29 }
  0x36   : > { %850 = dma.done.wait (%p946_p6), %s161_s5, 192  }
  0x37   : > { %852 = vsyncadd (%p946_p6), %s161_s5, 4294967104  ;;  %v219_v0 = vld [vmem:[%s1010_s8 + $0x8] sm:$0xf]  ;;  %v196_v1 = vld [vmem:[%s1010_s8] sm:$0xff]  ;;  %s874_s30 = smov 126   ;;  %s875_s4 = smov 127  }
  0x38   : > { %227 = vrot.lane.b32.xlu1 %v219_v0, %s874_s30  ;;  %204 = vrot.lane.b32.xlu0 %v196_v1, %s875_s4  ;;  %v222_v2 = vcombine.high %v196_v1, %v196_v1  ;;  %192 = vst [vmem:[#allocation2] sm:$0xf] %v196_v1  ;;  %vm194_vm0 = vcmask 257024   ;;  %v188_v3 = vld [vmem:[%s1010_s8 + $0x8] sm:$0xf]  ;;  %s876_s22 = smov 110   ;;  %v200_v6 = vcombine.low %v196_v1, %v196_v1 }
  0x39   : > { %v771_v4 = vld [vmem:[%s1010_s8 + $0x8] ss:$0 sps:$4 sm:$0xff]   ;;  %195 = vst.msk [vmem:[#allocation2 + $0x10] sm:$0xf] %vm194_vm0, %v188_v3  ;;  %s877_s6 = smov 109   ;;  %s878_s7 = smov 108  }
  0x3a   : > { %193 = vst [vmem:[#allocation2 + $0x8] sm:$0xf] %v222_v2  ;;  %v772_v5 = vld [vmem:[%s1010_s8 + $0x8] ss:$0 sps:$4 sm:$0xff]   ;;  %s879_s9 = smov 92   ;;  %s880_s10 = smov 91  }
  0x3b   : > { %v260_v7 = vld [vmem:[%s1010_s8 + $0x8] sm:$0xf]  ;;  %s881_s11 = smov 90   ;;  %v882_v12 = vmov 0.0   ;;  %vm390_vm1 = vcmask 293888   ;;  %v883_v16 = vmov 0  }
  0x3c   : > { %225 = vrot.lane.b32.xlu1 %v222_v2, %s874_s30  ;;  %246 = vrot.lane.b32.xlu0 %v196_v1, %s876_s22  ;;  %v773_v8 = vld [vmem:[%s1010_s8 + $0x8] ss:$0 sps:$4 sm:$0xff]   ;;  %vm229_vm2 = vcmask 1031168   ;;  %vm216_vm3 = vcmask 261124   ;;  %vm250_vm4 = vcmask 900096   ;;  %vm208_vm5 = vcmask 1039360  }
  0x3d   : > { %v301_v9 = vld [vmem:[%s1010_s8 + $0x8] sm:$0xf]  ;;  %471 = vmatprep.mubr.f32.mxu0 %v882_v12  ;;  %767 = vset.pattern.permute.xlu0 %v883_v16  ;;  %vm270_vm6 = vcmask 891904   ;;  %vm291_vm7 = vcmask 883712   ;;  %vm311_vm8 = vcmask 752640   ;;  %vm332_vm9 = vcmask 744448  }
  0x3e   : > { %v774_v10 = vld [vmem:[%s1010_s8 + $0x8] ss:$0 sps:$4 sm:$0xff]   ;;  %768 = vset.pattern.permute.xlu1 %v883_v16  ;;  %vm352_vm10 = vcmask 736256   ;;  %vm397_vm11 = vcmask 1043456   ;;  %vm561_vm12 = vcmask 261120   ;;  %p1131_p11 = scmp.ne.s32.totalorder %s1126_s23, 0 }
  0x3f   : > { %v342_v11 = vld [vmem:[%s1010_s8 + $0x8] sm:$0xf]  ;;  %s707_s8 = smul.u32 48, %s1006_s28 }
  0x40   : > { %248 = vrot.lane.b32.xlu1 %v771_v4, %s876_s22  ;;  %206 = vrot.lane.b32.xlu0 %v772_v5, %s875_s4  ;;  %v1031_v13 = vld [vmem:[%s1121_s1] sm:$0xff]  ;;  %v379_v15 = vld [vmem:[%s1122_s2 + $0x8] sm:$0xff] }
  0x41   : > { %685 = vmatprep.mubr.msk.f32.mxu1 %vm390_vm1, %v1031_v13  ;;  %v378_v14 = vld [vmem:[%s1122_s2] sm:$0xff] }
  0x44   : > { %223 = vrot.lane.b32.xlu1 %v196_v1, %s874_s30  ;;  %202 = vrot.lane.b32.xlu0 %v200_v6, %s875_s4  ;;  %s186_s30 = scalar_lea.vmem [#allocation6], %s707_s8 }
  0x45   : > { %s580_s4 = sshll.u32 %s186_s30, 4  ;;  %s1071_s4 = int_to_ptr.vmem [resolvable:$true] %s580_s4 }
  0x48   : > { %266 = vrot.lane.b32.xlu1 %v222_v2, %s877_s6  ;;  %244 = vrot.lane.b32.xlu0 %v200_v6, %s876_s22  ;;  %s708_s22 = smul.u32 768, %s928_s16  ;;  %s567_s16 = scalar_lea.sflag [#allocation5], %s1006_s28 }
  0x4c   : > { %287 = vrot.lane.b32.xlu1 %v196_v1, %s878_s7  ;;  %268 = vrot.lane.b32.xlu0 %v260_v7, %s877_s6 }
  0x50   : > { %307 = vrot.lane.b32.xlu1 %v222_v2, %s879_s9  ;;  %289 = vrot.lane.b32.xlu0 %v773_v8, %s878_s7 }
  0x54   : > { %328 = vrot.lane.b32.xlu1 %v196_v1, %s880_s10  ;;  %309 = vrot.lane.b32.xlu0 %v301_v9, %s879_s9 }
  0x58   : > { %264 = vrot.lane.b32.xlu1 %v196_v1, %s877_s6  ;;  %330 = vrot.lane.b32.xlu0 %v774_v10, %s880_s10 }
  0x5c   : > { %305 = vrot.lane.b32.xlu1 %v196_v1, %s879_s9  ;;  %285 = vrot.lane.b32.xlu0 %v200_v6, %s878_s7  ;;  %s1076_s9 = scalar_lea.hbm %s1123_s3, %s708_s22 }
  0x60   : > { %348 = vrot.lane.b32.xlu1 %v222_v2, %s881_s11  ;;  %326 = vrot.lane.b32.xlu0 %v200_v6, %s880_s10  ;;  %s805_s10 = scalar_lea.vmem %s1071_s4, 768 }
  0x61   : > { %p806_p6 = scmp.ne.s32.totalorder %s1071_s4, %s805_s10 }
  0x63   : > { %p807_p12 = pnand %p806_p6, %p1131_p11 }
  0x64   : > { %346 = vrot.lane.b32.xlu1 %v196_v1, %s881_s11  ;;  %350 = vrot.lane.b32.xlu0 %v342_v11, %s881_s11  ;;  %s884_s11 = smov [#allocation6]  }
  0x65   : > { %p808_p13 = pneg %p807_p12  ;;  %s809_s17 = sshll.u32 %s884_s11, 4  ;;  %s810_s17 = int_to_ptr.vmem [resolvable:$false] %s809_s17 }
  0x66   : > { %s811_s19 = scalar_lea.vmem %s810_s17, 1536  ;;  %p812_p5 = scmp.lt.s32.totalorder %s1071_s4, %s810_s17 }
  0x67   : > { %p813_p10 = scmp.lt.s32.totalorder %s811_s19, %s805_s10 }
  0x68   : > { %382 = vperm.xlu0 %767, %v378_v14   ;;  %387 = vperm.xlu1 %768, %v379_v15   ;;  %v362_v14 = vld [vmem:[%s1121_s1 + $0x8] sm:$0xff] }
  0x69   : > { %p814_p2 = por %p813_p10, %p812_p5 }
  0x6b   : > { %p815_p4 = pnand %p814_p2, %p808_p13 }
  0xaa   : > { %v228_v17 = vpop.permute.xlu1 %227  ;;  %v205_v18 = vpop.permute.xlu0 %204 }
  0xab   : > { %237 = vst.msk [vmem:[#allocation2 + $0x28] sm:$0xf] %vm194_vm0, %v228_v17 }
  0xae   : > { %v226_v19 = vpop.permute.xlu1 %225  ;;  %v247_v20 = vpop.permute.xlu0 %246 }
  0xaf   : > { %v231_v21 = vsel %vm229_vm2, %v226_v19, %v228_v17 }
  0xb0   : > { %236 = vst [vmem:[#allocation2 + $0x20] sm:$0xf] %v231_v21 }
  0xb2   : > { %v249_v22 = vpop.permute.xlu1 %248  ;;  %v207_v23 = vpop.permute.xlu0 %206 }
  0xb3   : > { %v252_v24 = vsel %vm250_vm4, %v247_v20, %v249_v22  ;;  %258 = vst.msk [vmem:[#allocation2 + $0x28] sm:$0xf0] %vm216_vm3, %v249_v22  ;;  %v210_v25 = vsel %vm208_vm5, %v205_v18, %v207_v23  ;;  %217 = vst.msk [vmem:[#allocation2 + $0x10] sm:$0xf0] %vm216_vm3, %v207_v23 }
  0xb4   : > { %257 = vst [vmem:[#allocation2 + $0x20] sm:$0xf0] %v252_v24  ;;  %215 = vst [vmem:[#allocation2 + $0x8] sm:$0xf0] %v210_v25 }
  0xb6   : > { %v224_v26 = vpop.permute.xlu1 %223  ;;  %v203_v27 = vpop.permute.xlu0 %202 }
  0xb7   : > { %v230_v28 = vsel %vm229_vm2, %v224_v26, %v226_v19  ;;  %v209_v29 = vsel %vm208_vm5, %v203_v27, %v205_v18 }
  0xb8   : > { %235 = vst [vmem:[#allocation2 + $0x18] sm:$0xf] %v230_v28  ;;  %214 = vst [vmem:[#allocation2] sm:$0xf0] %v209_v29 }
  0xba   : > { %v267_v30 = vpop.permute.xlu1 %266  ;;  %v245_v31 = vpop.permute.xlu0 %244  ;;  %v365_v32 = vld [vmem:[#allocation2 + $0x10] sm:$0xff]  ;;  %v368_v33 = vld [vmem:[#allocation2 + $0x28] sm:$0xff] }
  0xbb   : > { %v251_v34 = vsel %vm250_vm4, %v245_v31, %v247_v20  ;;  %v696_v35 = vpack.c.bf16 %v368_v33, %v365_v32  ;;  %v364_v36 = vld [vmem:[#allocation2 + $0x8] sm:$0xff]  ;;  %v367_v37 = vld [vmem:[#allocation2 + $0x20] sm:$0xff] }
  0xbc   : > { %256 = vst [vmem:[#allocation2 + $0x18] sm:$0xf0] %v251_v34  ;;  %v688_v38 = vpack.c.bf16 %v367_v37, %v364_v36 }
  0xbd   : > { %697 = vmatprep.subr.bf16.mxu1 %v696_v35 }
  0xbe   : > { %v288_v39 = vpop.permute.xlu1 %287  ;;  %v269_v40 = vpop.permute.xlu0 %268  ;;  %689 = vmatprep.subr.bf16.mxu0 %v688_v38  ;;  %699 = vmatpush3.bf16.msra.mxu1 %v696_v35 }
  0xbf   : > { %v272_v41 = vsel %vm270_vm6, %v267_v30, %v269_v40  ;;  %278 = vst.msk [vmem:[#allocation2 + $0x40] sm:$0xf] %vm194_vm0, %v269_v40  ;;  %v363_v45 = vld [vmem:[#allocation2] sm:$0xff] }
  0xc0   : > { %277 = vst [vmem:[#allocation2 + $0x38] sm:$0xf] %v272_v41 }
  0xc2   : > { %v308_v42 = vpop.permute.xlu1 %307  ;;  %v290_v43 = vpop.permute.xlu0 %289 }
  0xc3   : > { %v293_v44 = vsel %vm291_vm7, %v288_v39, %v290_v43  ;;  %299 = vst.msk [vmem:[#allocation2 + $0x40] sm:$0xf0] %vm216_vm3, %v290_v43  ;;  %v366_v46 = vld [vmem:[#allocation2 + $0x18] sm:$0xff] }
  0xc4   : > { %298 = vst [vmem:[#allocation2 + $0x38] sm:$0xf0] %v293_v44  ;;  %v690_v47 = vpack.c.bf16 %v366_v46, %v363_v45 }
  0xc6   : > { %v329_v48 = vpop.permute.xlu1 %328  ;;  %v310_v49 = vpop.permute.xlu0 %309  ;;  %691 = vmatpush1.bf16.msra.mxu0 %v690_v47 }
  0xc7   : > { %v313_v50 = vsel %vm311_vm8, %v308_v42, %v310_v49  ;;  %319 = vst.msk [vmem:[#allocation2 + $0x58] sm:$0xf] %vm194_vm0, %v310_v49 }
  0xc8   : > { %318 = vst [vmem:[#allocation2 + $0x50] sm:$0xf] %v313_v50 }
  0xca   : > { %v265_v51 = vpop.permute.xlu1 %264  ;;  %v331_v52 = vpop.permute.xlu0 %330  ;;  %v371_v61 = vld [vmem:[#allocation2 + $0x40] sm:$0xff] }
  0xcb   : > { %v271_v53 = vsel %vm270_vm6, %v265_v51, %v267_v30  ;;  %v334_v54 = vsel %vm332_vm9, %v329_v48, %v331_v52  ;;  %340 = vst.msk [vmem:[#allocation2 + $0x58] sm:$0xf0] %vm216_vm3, %v331_v52  ;;  %v370_v1 = vld [vmem:[#allocation2 + $0x38] sm:$0xff] }
  0xcc   : > { %276 = vst [vmem:[#allocation2 + $0x30] sm:$0xf] %v271_v53  ;;  %339 = vst [vmem:[#allocation2 + $0x50] sm:$0xf0] %v334_v54 }
  0xce   : > { %v306_v55 = vpop.permute.xlu1 %305  ;;  %v286_v56 = vpop.permute.xlu0 %285 }
  0xcf   : > { %v312_v57 = vsel %vm311_vm8, %v306_v55, %v308_v42  ;;  %v292_v58 = vsel %vm291_vm7, %v286_v56, %v288_v39 }
  0xd0   : > { %317 = vst [vmem:[#allocation2 + $0x48] sm:$0xf] %v312_v57  ;;  %297 = vst [vmem:[#allocation2 + $0x30] sm:$0xf0] %v292_v58 }
  0xd2   : > { %v349_v59 = vpop.permute.xlu1 %348  ;;  %v327_v60 = vpop.permute.xlu0 %326  ;;  %v374_v62 = vld [vmem:[#allocation2 + $0x58] sm:$0xff] }
  0xd3   : > { %v333_v63 = vsel %vm332_vm9, %v327_v60, %v329_v48  ;;  %v700_v0 = vpack.c.bf16 %v374_v62, %v371_v61  ;;  %v373_v2 = vld [vmem:[#allocation2 + $0x50] sm:$0xff] }
  0xd4   : > { %338 = vst [vmem:[#allocation2 + $0x48] sm:$0xf0] %v333_v63  ;;  %v692_v3 = vpack.c.bf16 %v373_v2, %v370_v1 }
  0xd5   : > { %701 = vmatprep.subr.bf16.mxu1 %v700_v0 }
  0xd6   : > { %v347_v4 = vpop.permute.xlu1 %346  ;;  %v351_v5 = vpop.permute.xlu0 %350  ;;  %693 = vmatprep.subr.bf16.mxu0 %v692_v3  ;;  %703 = vmatpush3.bf16.msra.mxu1 %v700_v0 }
  0xd7   : > { %v353_v6 = vsel %vm352_vm10, %v347_v4, %v349_v59  ;;  %v354_v7 = vsel %vm352_vm10, %v349_v59, %v351_v5  ;;  %360 = vst.msk [vmem:[#allocation2 + $0x70] sm:$0xf] %vm194_vm0, %v351_v5  ;;  %v369_v8 = vld [vmem:[#allocation2 + $0x30] sm:$0xff] }
  0xd8   : > { %358 = vst [vmem:[#allocation2 + $0x60] sm:$0xf] %v353_v6  ;;  %359 = vst [vmem:[#allocation2 + $0x68] sm:$0xf] %v354_v7 }
  0xdb   : > { %v372_v9 = vld [vmem:[#allocation2 + $0x48] sm:$0xff] }
  0xdc   : > { %v694_v10 = vpack.c.bf16 %v372_v9, %v369_v8 }
  0xde   : > { %695 = vmatpush1.bf16.msra.mxu0 %v694_v10  ;;  %v377_v11 = vld [vmem:[#allocation2 + $0x70] sm:$0xf] }
  0xdf   : > { %683 = vmatprep.subr.msk.mxu1 %vm397_vm11, %v377_v11  ;;  %v376_v15 = vld [vmem:[#allocation2 + $0x68] sm:$0xf]  ;;  %v375_v16 = vld [vmem:[#allocation2 + $0x60] sm:$0xf] }
  0xe0   : > { %658 = vmatprep.subr.msk.mxu0 %vm397_vm11, %v376_v15  ;;  %684 = vmatpush3.msk.msra.mxu1 %vm397_vm11, %v377_v11 }
  0xe1   : > { %686 = vmatmul.mubr.msk.f32.vlgmr.msra.gmra.mrb[0].mxu1 %vm390_vm1, %v362_v14 }
  0xe2   : > { %659 = vmatpush1.msk.msra.mxu0 %vm397_vm11, %v375_v16 }
  0xe3   : > { %660 = vmatmul.mubr.msk.f32.vlgmr.msra.gmra.mrb[0].mxu0 %vm390_vm1, %v1031_v13 }
  0xe4   : > { %477 = vmatprep.mubr.f32.mxu0 %v882_v12 }
  0xe7   : > { %661 = vmatmul.mubr.msk.f32.gmra.mrb[2].mxu0 %vm390_vm1, %v362_v14  ;;  %v388_v17 = vpop.permute.xlu1 %387  ;;  %v383_v18 = vpop.permute.xlu0 %382 }
 0x1b4   : > { %v687_v19 = vpop.f32.mrb[0].mxu1 }
 0x1b5   : > { %v556_v20 = vadd.f32 %v687_v19, %v388_v17  ;;  %v550_v21 = vpop.f32.mrb[1].mxu1 }
 0x1b6   : > { %v473_v22 = vpop.f32.mrb[0].mxu0  ;;  %v551_v23 = vadd.f32 %v550_v21, %v383_v18 }
 0x1b7   : > { %v474_v24 = vadd.f32 %v473_v22, %v383_v18  ;;  %v475_v25 = vpop.f32.mrb[1].mxu0  ;;  %565 = vst.msk [vmem:[%s186_s30 + $0x28] sm:$0xff] %vm561_vm12, %v556_v20 }
 0x1b8   : > { %v476_v12 = vadd.f32 %v475_v25, %v383_v18  ;;  %562 = vst.msk [vmem:[%s186_s30 + $0x10] sm:$0xff] %vm561_vm12, %v551_v23 }
 0x1b9   : > { %559 = vst [vmem:[%s186_s30] sm:$0xff] %v474_v24 }
 0x1ba   : > { %560 = vst [vmem:[%s186_s30 + $0x8] sm:$0xff] %v476_v12  ;;  %v479_v13 = vpop.f32.mrb[2].mxu0 }
 0x1bb   : > { %v480_v26 = vadd.f32 %v479_v13, %v388_v17  ;;  %v481_v27 = vpop.f32.mrb[3].mxu0 }
 0x1bc   : > { %v482_v28 = vadd.f32 %v481_v27, %v388_v17 }
 0x1bd   : > { %563 = vst [vmem:[%s186_s30 + $0x18] sm:$0xff] %v480_v26 }
 0x1be   : > { %564 = vst [vmem:[%s186_s30 + $0x20] sm:$0xff] %v482_v28 }
 0x1bf   : > { %818 = shalt.err (!%p815_p4)
}
 0x1c0   : > { %s819_s20 = scalar_lea.hbm %s1076_s9, 768  ;;  %s823_s27 = scalar_lea.hbm %s1123_s3, 1536 }
 0x1c1   : > { %p820_p7 = scmp.ne.s32.totalorder %s1076_s9, %s819_s20  ;;  %p824_p0 = scmp.lt.u32.totalorder %s1076_s9, %s1123_s3 }
 0x1c2   : > { %p825_p1 = scmp.lt.u32.totalorder %s823_s27, %s819_s20  ;;  %p827_p6 = scmp.lt.u32.totalorder %s819_s20, %s1076_s9 }
 0x1c3   : > { %p821_p8 = pnand %p820_p7, %p1131_p11 }
 0x1c4   : > { %p826_p3 = por %p825_p1, %p824_p0 }
 0x1c5   : > { %p822_p9 = pneg %p821_p8 }
 0x1c6   : > { %p828_p12 = por %p827_p6, %p826_p3 }
 0x1c8   : > { %p829_p13 = pnand %p828_p12, %p822_p9 }
 0x1ca   : > { %832 = shalt.err (!%p829_p13)
}
 0x1cb   : > { %s885_s8 = smov 384   ;;  %s886_s30 = smov 24  }
 0x1cc   : > { %711 = dma.vmem_to_hbm [thread:$0]  (%p1131_p11), %s1071_s4, 768, %s1076_s9, %s567_s16, %s885_s8, %s885_s8, %s886_s30  }
 0x1cd PF: > { %s595_s22 = sand.u32 1, %s859_s12   ;;  %p1132_p5 = scmp.ne.s32.totalorder %s1127_s24, 0 }
 0x1ce   : > { %p1133_p10 = scmp.ge.s32.totalorder %s871_s15, 2  ;;  %s596_s6 = scalar_lea.sflag [#allocation5], %s595_s22 }
 0x1d0   : > { %p718_p2 = pnand %p1133_p10, %p1132_p5 }
 0x1d2   : > { %854 = dma.done.wait (!%p718_p2), %s596_s6, 768  }
 0x1d3   : > { %856 = vsyncadd (!%p718_p2), %s596_s6, 4294966528  ;;  %p16_p4 = scmp.ge.s32.totalorder %s932_s18, 4   ;;  %s1134_s12 = smov %s863_s13 }
 0x1d4   : > { %s1135_s13 = smov %s867_s14  ;;  %s1136_s14 = smov %s944_s21 }
 0x1d5   : > { %s1137_s15 = smov %s932_s18  ;;  %18 = sbr.rel (!%p16_p4) target bundleno = 5 (0x5), region = 77 }
 0x1dc   :  { %601 = vsyncpa [#allocation4], 1 }
 0x1dd   :  { %603 = vsyncpa [#allocation4 + $0x1], 1 }
 0x1de   :  { %604 = vsyncpa [#allocation5], 1 }
 0x1df   :  { %606 = vsyncpa [#allocation5 + $0x1], 1 }

</bundles_post_ra>
